<compile_context>
chip_gen: v7x
topology: tpu7x:2x2x1
jax: 0.10.0
libtpu: 0.0.40
codegen_flags: <defaults>
</compile_context>

<pallas_src>
import math

import jax
import jax.numpy as jnp
from jax.experimental import pallas as pl
from jax.experimental.pallas import tpu as pltpu

_LANE_CHOICES = (1024, 512, 256, 128)   # lane-dense slab widths (x128 lanes)
_TARGET_BLOCK_ELEMS = 1024 * 1024       # ~4 MiB f32 per block buffer


def _round_up(a, b):
    return -(-a // b) * b


def _affine_kernel(x_ref, o_ref):
    # (x * 2 + 3) / 4  ==  x * 0.5 + 0.75  (exact in binary FP)
    o_ref[...] = x_ref[...] * 0.5 + 0.75


def pt_module_forward(x, *, min_pallas_elems=64 * 1024):
    """Equivalent of PtModule.forward: stack_i((x[i]*2 + 3) / 4)."""
    orig_shape = x.shape
    orig_dtype = x.dtype
    n = math.prod(orig_shape)

    # Fallback path: tiny tensors (launch overhead dominates), non-float
    # dtypes (different promotion semantics), or sizes not divisible by a
    # full vreg lane width (avoids host-side pad + slice round trips).
    lanes = next((l for l in _LANE_CHOICES if n % l == 0), None)
    if (n == 0 or n < min_pallas_elems or lanes is None
            or not jnp.issubdtype(orig_dtype, jnp.floating)):
        return (x * 2 + 3) / 4

    rows = n // lanes
    slab = x.reshape(rows, lanes)        # zero-copy metadata reshape

    max_block_rows = max(8, _TARGET_BLOCK_ELEMS // lanes)
    if rows < 16:
        block_rows = rows                # full-extent block (always legal)
    elif rows <= max_block_rows:
        # >= 2 grid steps so both TensorCores on 2-TC chips (v7x) get work.
        block_rows = _round_up(pl.cdiv(rows, 2), 8)
    else:
        block_rows = max_block_rows      # multiple of 8; last block partial

    grid = (pl.cdiv(rows, block_rows),)

    out_slab = pl.pallas_call(
        _affine_kernel,
        out_shape=jax.ShapeDtypeStruct((rows, lanes), orig_dtype),
        grid_spec=pltpu.PrefetchScalarGridSpec(
            num_scalar_prefetch=0,
            grid=grid,
            in_specs=[pl.BlockSpec((block_rows, lanes), lambda i: (i, 0))],
            out_specs=pl.BlockSpec((block_rows, lanes), lambda i: (i, 0)),
        ),
        input_output_aliases={0: 0},     # donate input slab -> output slab
        cost_estimate=pl.CostEstimate(
            flops=2 * n,
            transcendentals=0,
            bytes_accessed=2 * n * jnp.dtype(orig_dtype).itemsize,
        ),
        compiler_params=pltpu.CompilerParams(
            dimension_semantics=("parallel",),
            vmem_limit_bytes=32 << 20,
        ),
    )(slab)

    return out_slab.reshape(orig_shape)


if __name__ == "__main__":
    key = jax.random.PRNGKey(0)
    x = jax.random.normal(key, (2, 4, 16, 16), dtype=jnp.float32)

    # Reference computed first (input slab may be aliased/donated under jit).
    ref = (x * 2.0 + 3.0) / 4.0

    # Force the Pallas path even for this small test tensor.
    out = pt_module_forward(x, min_pallas_elems=0)
    out = jax.block_until_ready(out)

    assert out.shape == x.shape and out.dtype == x.dtype
    assert jnp.allclose(out, ref, atol=1e-6, rtol=1e-6)

    # Also exercise the default (fallback-eligible) entry point once.
    out2 = jax.block_until_ready(pt_module_forward(x))
    assert jnp.allclose(out2, ref, atol=1e-6, rtol=1e-6)

    print("KERNEL_OK")
</pallas_src>

<mosaic_0001>
module attributes {stable_mosaic.version = 11 : i64} {
  func.func @_affine_kernel(%arg0: i32, %arg1: memref<2x1024xf32, #tpu.memory_space<vmem>>, %arg2: memref<2x1024xf32, #tpu.memory_space<vmem>>) attributes {dimension_semantics = [#tpu.dimension_semantics<parallel>], iteration_bounds = array<i64: 1>, scalar_prefetch = 0 : i64, scratch_operands = 0 : i64, tpu.core_type = #tpu.core_type<tc>, window_params = [{transform_indices = @transform_0, window_bounds = array<i64: 2, 1024>}, {transform_indices = @transform_1, window_bounds = array<i64: 2, 1024>}]} {
    %c0 = arith.constant 0 : index
    %c0_0 = arith.constant 0 : index
    %0 = vector.load %arg1[%c0, %c0_0] : memref<2x1024xf32, #tpu.memory_space<vmem>>, vector<2x1024xf32>
    %cst = arith.constant 5.000000e-01 : f32
    %1 = vector.broadcast %cst : f32 to vector<2x1024xf32>
    %2 = arith.mulf %0, %1 : vector<2x1024xf32>
    %cst_1 = arith.constant 7.500000e-01 : f32
    %3 = vector.broadcast %cst_1 : f32 to vector<2x1024xf32>
    %4 = arith.addf %2, %3 : vector<2x1024xf32>
    %c0_2 = arith.constant 0 : index
    %c0_3 = arith.constant 0 : index
    %5 = vector.load %arg2[%c0_2, %c0_3] : memref<2x1024xf32, #tpu.memory_space<vmem>>, vector<2x1024xf32>
    tpu.vector_store %arg2[%c0_2, %c0_3], %4 {strides = array<i32>} : memref<2x1024xf32, #tpu.memory_space<vmem>>, vector<2x1024xf32>,
    return
  }
  func.func @transform_0(%arg0: i32) -> (i32, i32) {
    %c0_i32 = arith.constant 0 : i32
    %c0_i32_0 = arith.constant 0 : i32
    return %arg0, %c0_i32 : i32, i32
  }
  func.func @transform_1(%arg0: i32) -> (i32, i32) {
    %c0_i32 = arith.constant 0 : i32
    %c0_i32_0 = arith.constant 0 : i32
    return %arg0, %c0_i32 : i32, i32
  }
}

</mosaic_0001>

<bundles_post_ra>
// kernel: tpu_custom_call.1
= control target key start
LH: loop header
LB: loop body
LE: loop exit
PB: predicated region body
PF: predicated region fallthrough
CT: control target
= control target key end

     0   :  { %6 = vsyncpa [#allocation3], 0  ;;  %s130_s0 = inlined_call_operand.hbm [shape: f32[2,1024], index: 0, kind: input, shape index: {}, may-alias: {0,1}]   ;;  %s131_s1 = inlined_call_operand.hbm [shape: f32[2,1024], index: 1, kind: output, shape index: {}, may-alias: {0,1}]  }
   0x1   :  { %7 = vsyncpa [#allocation4], 0  ;;  %s94_s6 = smov [#allocation2]   ;;  %s46_s10 = scalar_lea.hbm %s130_s0, 256 }
   0x2   :  { %s14_s7 = sshll.u32 %s94_s6, 4  ;;  %p47_p0 = scmp.ne.s32.totalorder %s130_s0, %s46_s10  ;;  %s15_s7 = int_to_ptr.vmem [resolvable:$true] %s14_s7 }
   0x3   :  { %p50_p1 = scmp.lt.u32.totalorder %s46_s10, %s130_s0 }
   0x5   :  { %p52_p2 = pnand %p50_p1, %p47_p0 }
   0x7   :  { %55 = shalt.err (!%p52_p2)
}
   0x8   :  { %s56_s15 = scalar_lea.vmem %s15_s7, 256  ;;  %p61_p4 = scmp.lt.s32.totalorder %s15_s7, %s15_s7 }
   0x9   :  { %p57_p3 = scmp.ne.s32.totalorder %s15_s7, %s56_s15  ;;  %p62_p5 = scmp.lt.s32.totalorder %s56_s15, %s56_s15 }
   0xb   :  { %p63_p6 = por %p62_p5, %p61_p4 }
   0xd   :  { %p64_p7 = pnand %p63_p6, %p57_p3 }
   0xf   :  { %67 = shalt.err (!%p64_p7)
}
  0x10   :  { %17 = dma.hbm_to_vmem [thread:$0]  %s130_s0, 256, %s15_s7, [#allocation3]  }
  0x11   :  { %90 = dma.done.wait [#allocation3], 256  }
  0x12   :  { %91 = vsyncadd [#allocation3], 4294967040  ;;  %v21_v0 = vld [vmem:[#allocation2] sm:$0xff]  ;;  %v22_v1 = vld [vmem:[#allocation2 + $0x8] sm:$0xff]  ;;  %s95_s18 = smov [#allocation5]  }
  0x13   :  { %s35_s19 = sshll.u32 %s95_s18, 4  ;;  %v23_v2 = vmul.f32 0.5, %v21_v0  ;;  %v24_v3 = vmul.f32 0.5, %v22_v1  ;;  %s36_s19 = int_to_ptr.vmem [resolvable:$true] %s35_s19 }
  0x14   :  { %s68_s20 = scalar_lea.vmem %s36_s19, 256  ;;  %p73_p9 = scmp.lt.s32.totalorder %s36_s19, %s36_s19 }
  0x15   :  { %v25_v4 = vadd.f32 0.75, %v23_v2  ;;  %v26_v5 = vadd.f32 0.75, %v24_v3  ;;  %p69_p8 = scmp.ne.s32.totalorder %s36_s19, %s68_s20  ;;  %p74_p10 = scmp.lt.s32.totalorder %s68_s20, %s68_s20 }
  0x17   :  { %27 = vst [vmem:[#allocation5] sm:$0xff] %v25_v4  ;;  %28 = vst [vmem:[#allocation5 + $0x8] sm:$0xff] %v26_v5  ;;  %p75_p11 = por %p74_p10, %p73_p9 }
  0x19   :  { %p76_p12 = pnand %p75_p11, %p69_p8 }
  0x1b   :  { %79 = shalt.err (!%p76_p12)
}
  0x1c   :  { %s80_s22 = scalar_lea.hbm %s131_s1, 256 }
  0x1d   :  { %p81_p13 = scmp.ne.s32.totalorder %s131_s1, %s80_s22  ;;  %p84_p0 = scmp.lt.u32.totalorder %s80_s22, %s131_s1 }
  0x1f   :  { %p86_p1 = pnand %p84_p0, %p81_p13 }
  0x21   :  { %89 = shalt.err (!%p86_p1)
}
  0x22   :  { %38 = dma.vmem_to_hbm [thread:$0]  %s36_s19, 256, %s131_s1, [#allocation4]  }
  0x23   :  { %92 = dma.done.wait [#allocation4], 256  }
  0x24   :  { %93 = vsyncadd [#allocation4], 4294967040 }
  0x25   :  { %42 = vsyncpa [#allocation3], 1 }
  0x26   :  { %43 = vsyncpa [#allocation4], 1 }

</bundles_post_ra>
